<compile_context>
chip_gen: v5e
topology: v5e:2x2
jax: 0.10.0
libtpu: 0.0.40
codegen_flags: <defaults>
</compile_context>

<pallas_src>
import functools

import jax
import jax.numpy as jnp
from jax.experimental import pallas as pl
from jax.experimental.pallas import tpu as pltpu

EPS = 1e-5


def adain_residual_kernel(x_ref, gb_ref, o_ref, *, hw_true, n_pad_lanes):
    """Fused adaIN (unbiased var, torch.var default) + affine + residual add.

    x_ref:  (TR, HW_pad)  rows = (batch, channel) pairs, lanes zero-padded
    gb_ref: (TR, 2)       column 0 = gamma, column 1 = beta
    o_ref:  (TR, HW_pad)
    """
    inv_hw = 1.0 / hw_true
    inv_hw_m1 = 1.0 / (hw_true - 1)  # torch.var default: unbiased (N-1)

    # Pass 1: row means (reduction rides the XLU slot).
    sum_x = jnp.sum(x_ref[...].astype(jnp.float32), axis=1, keepdims=True)
    mean = sum_x * inv_hw                                     # (TR, 1)

    # Pass 2: centered two-pass variance (matches PyTorch numerics).
    # Zero-padded lanes each contribute mean^2 to the sum; subtract exactly.
    d = x_ref[...].astype(jnp.float32) - mean                 # (TR, HW_pad)
    ss = jnp.sum(d * d, axis=1, keepdims=True)                # (TR, 1)
    if n_pad_lanes:
        ss = ss - float(n_pad_lanes) * (mean * mean)
    var = jnp.maximum(ss * inv_hw_m1, 0.0)

    gb = gb_ref[...].astype(jnp.float32)                      # (TR, 2)
    gamma = gb[:, 0:1]
    beta = gb[:, 1:2]

    # x + (x - mean) * rsqrt(var+eps) * gamma + beta  ==  x*a + c
    s = gamma * jax.lax.rsqrt(var + EPS)                      # EUP rsqrt (free slot)
    a = 1.0 + s
    c = beta - mean * s

    # Pass 3: single FMA pass; re-read x_ref (no long-lived f32 tile copy).
    o_ref[...] = (x_ref[...].astype(jnp.float32) * a + c).astype(o_ref.dtype)


def resnet_adain_block(x, gamma, beta, conv1_w=None, conv2_w=None):
    """x: (N, C, H, W), gamma/beta: (N, C).

    conv1_w / conv2_w are module parameters, but their outputs are discarded
    by the reference forward, so they are accepted only for parameter parity
    and intentionally not applied."""
    N, C, H, W = x.shape
    R, HW = N * C, H * W
    assert HW > 1, "unbiased instance-norm variance requires H*W > 1"

    sublane = 16 if x.dtype == jnp.bfloat16 else 8
    lane = 128
    R_pad = ((R + sublane - 1) // sublane) * sublane
    HW_pad = ((HW + lane - 1) // lane) * lane

    xf = x.reshape(R, HW)
    if HW_pad != HW:
        # Keep output stores lane-dense (avoid masked vst.msk partial stores).
        xf = jnp.pad(xf, ((0, 0), (0, HW_pad - HW)))
    if R_pad != R:
        xf = jnp.pad(xf, ((0, R_pad - R), (0, 0)))

    # Merge gamma/beta into one (R_pad, 2) stream (one fewer DMA stream).
    gb = jnp.stack(
        [gamma.reshape(R).astype(jnp.float32), beta.reshape(R).astype(jnp.float32)],
        axis=1,
    )
    if R_pad != R:
        gb = jnp.pad(gb, ((0, R_pad - R), (0, 0)))

    # Row-tile sizing: always a sublane multiple (never a whole-array
    # fallback), ~4 MiB of f32 rows per tile, and prefer >= 4 grid steps when
    # the row count allows it so DMA pipelining / v7x 2-TC sharding kick in.
    bytes_per_row = HW_pad * 4  # f32 compute width
    tr_cap = max(sublane, (4 * 1024 * 1024) // bytes_per_row)
    TR = min(R_pad, tr_cap)
    tr_4steps = (R_pad // 4 // sublane) * sublane
    if tr_4steps >= sublane:
        TR = min(TR, tr_4steps)
    TR = max(sublane, (TR // sublane) * sublane)
    grid_r = pl.cdiv(R_pad, TR)

    kernel = functools.partial(
        adain_residual_kernel, hw_true=HW, n_pad_lanes=HW_pad - HW
    )

    out = pl.pallas_call(
        kernel,
        out_shape=jax.ShapeDtypeStruct((R_pad, HW_pad), x.dtype),
        grid=(grid_r,),
        in_specs=[
            pl.BlockSpec((TR, HW_pad), lambda i: (i, 0)),
            pl.BlockSpec((TR, 2), lambda i: (i, 0)),
        ],
        out_specs=pl.BlockSpec((TR, HW_pad), lambda i: (i, 0)),
        compiler_params=pltpu.CompilerParams(
            dimension_semantics=("parallel",),  # rows independent; 2 TCs on v7x
            vmem_limit_bytes=48 * 1024 * 1024,  # > 16/32 MiB defaults, < v7x 64 MiB
        ),
    )(xf, gb)

    out = out[:R, :HW]
    return out.reshape(N, C, H, W)


def _reference(x, gamma, beta):
    # Pure-JAX reference mirroring the PyTorch semantics, for verification.
    mean = jnp.mean(x, axis=(2, 3), keepdims=True)
    var = jnp.sum((x - mean) ** 2, axis=(2, 3), keepdims=True) / (
        x.shape[2] * x.shape[3] - 1
    )
    out_in = (x - mean) / jnp.sqrt(var + EPS)
    out = out_in * gamma[:, :, None, None] + beta[:, :, None, None]
    return x + out


if __name__ == "__main__":
    key = jax.random.PRNGKey(0)
    k1, k2, k3, k4, k5 = jax.random.split(key, 5)

    N, C, H, W = 2, 4, 16, 16  # dim = C = 4
    x = jax.random.normal(k1, (N, C, H, W), dtype=jnp.float32)
    gamma = jax.random.normal(k2, (N, C), dtype=jnp.float32)
    beta = jax.random.normal(k3, (N, C), dtype=jnp.float32)

    # Conv weights per __init__ shapes (dim, dim, 3, 3); dead code in forward.
    conv1_w = 0.1 * jax.random.normal(k4, (C, C, 3, 3), dtype=jnp.float32)
    conv2_w = 0.1 * jax.random.normal(k5, (C, C, 3, 3), dtype=jnp.float32)

    y = resnet_adain_block(x, gamma, beta, conv1_w, conv2_w)
    y = jax.block_until_ready(y)

    y_ref = _reference(x, gamma, beta)
    assert y.shape == (N, C, H, W)
    assert jnp.allclose(y, y_ref, atol=1e-4, rtol=1e-4)

    print("KERNEL_OK")
</pallas_src>

<mosaic_0001>
module attributes {stable_mosaic.version = 11 : i64} {
  func.func @adain_residual_kernel(%arg0: i32, %arg1: memref<8x256xf32, #tpu.memory_space<vmem>>, %arg2: memref<8x2xf32, #tpu.memory_space<vmem>>, %arg3: memref<8x256xf32, #tpu.memory_space<vmem>>) attributes {dimension_semantics = [#tpu.dimension_semantics<parallel>], iteration_bounds = array<i64: 1>, scalar_prefetch = 0 : i64, scratch_operands = 0 : i64, tpu.core_type = #tpu.core_type<tc>, window_params = [{transform_indices = @transform_0, window_bounds = array<i64: 8, 256>}, {transform_indices = @transform_1, window_bounds = array<i64: 8, 2>}, {transform_indices = @transform_2, window_bounds = array<i64: 8, 256>}]} {
    %c0 = arith.constant 0 : index
    %c0_0 = arith.constant 0 : index
    %0 = vector.load %arg1[%c0, %c0_0] : memref<8x256xf32, #tpu.memory_space<vmem>>, vector<8x256xf32>
    %cst = arith.constant dense<0.000000e+00> : vector<8xf32>
    %1 = vector.multi_reduction <add>, %0, %cst [1] : vector<8x256xf32> to vector<8xf32>
    %2 = vector.shape_cast %1 : vector<8xf32> to vector<8x1xf32>
    %cst_1 = arith.constant 3.906250e-03 : f32
    %3 = vector.broadcast %cst_1 : f32 to vector<8x1xf32>
    %4 = arith.mulf %2, %3 : vector<8x1xf32>
    %c0_2 = arith.constant 0 : index
    %c0_3 = arith.constant 0 : index
    %5 = vector.load %arg1[%c0_2, %c0_3] : memref<8x256xf32, #tpu.memory_space<vmem>>, vector<8x256xf32>
    %6 = vector.broadcast %4 : vector<8x1xf32> to vector<8x256xf32>
    %7 = arith.subf %5, %6 : vector<8x256xf32>
    %8 = arith.mulf %7, %7 : vector<8x256xf32>
    %cst_4 = arith.constant dense<0.000000e+00> : vector<8xf32>
    %9 = vector.multi_reduction <add>, %8, %cst_4 [1] : vector<8x256xf32> to vector<8xf32>
    %10 = vector.shape_cast %9 : vector<8xf32> to vector<8x1xf32>
    %cst_5 = arith.constant 0.00392156886 : f32
    %11 = vector.broadcast %cst_5 : f32 to vector<8x1xf32>
    %12 = arith.mulf %10, %11 : vector<8x1xf32>
    %cst_6 = arith.constant 0.000000e+00 : f32
    %13 = vector.broadcast %cst_6 : f32 to vector<8x1xf32>
    %14 = arith.maximumf %12, %13 : vector<8x1xf32>
    %c0_7 = arith.constant 0 : index
    %c0_8 = arith.constant 0 : index
    %15 = vector.load %arg2[%c0_7, %c0_8] : memref<8x2xf32, #tpu.memory_space<vmem>>, vector<8x2xf32>
    %16 = vector.extract_strided_slice %15 {offsets = [0, 0], sizes = [8, 1], strides = [1, 1]} : vector<8x2xf32> to vector<8x1xf32>
    %17 = vector.extract_strided_slice %15 {offsets = [0, 1], sizes = [8, 1], strides = [1, 1]} : vector<8x2xf32> to vector<8x1xf32>
    %cst_9 = arith.constant 9.99999974E-6 : f32
    %18 = vector.broadcast %cst_9 : f32 to vector<8x1xf32>
    %19 = arith.addf %14, %18 : vector<8x1xf32>
    %20 = math.rsqrt %19 : vector<8x1xf32>
    %21 = arith.mulf %16, %20 : vector<8x1xf32>
    %cst_10 = arith.constant 1.000000e+00 : f32
    %22 = vector.broadcast %cst_10 : f32 to vector<8x1xf32>
    %23 = arith.addf %22, %21 : vector<8x1xf32>
    %24 = arith.mulf %4, %21 : vector<8x1xf32>
    %25 = arith.subf %17, %24 : vector<8x1xf32>
    %c0_11 = arith.constant 0 : index
    %c0_12 = arith.constant 0 : index
    %26 = vector.load %arg1[%c0_11, %c0_12] : memref<8x256xf32, #tpu.memory_space<vmem>>, vector<8x256xf32>
    %27 = vector.broadcast %23 : vector<8x1xf32> to vector<8x256xf32>
    %28 = arith.mulf %26, %27 : vector<8x256xf32>
    %29 = vector.broadcast %25 : vector<8x1xf32> to vector<8x256xf32>
    %30 = arith.addf %28, %29 : vector<8x256xf32>
    %c0_13 = arith.constant 0 : index
    %c0_14 = arith.constant 0 : index
    %31 = vector.load %arg3[%c0_13, %c0_14] : memref<8x256xf32, #tpu.memory_space<vmem>>, vector<8x256xf32>
    tpu.vector_store %arg3[%c0_13, %c0_14], %30 {strides = array<i32>} : memref<8x256xf32, #tpu.memory_space<vmem>>, vector<8x256xf32>,
    return
  }
  func.func @transform_0(%arg0: i32) -> (i32, i32) {
    %c0_i32 = arith.constant 0 : i32
    %c0_i32_0 = arith.constant 0 : i32
    return %arg0, %c0_i32 : i32, i32
  }
  func.func @transform_1(%arg0: i32) -> (i32, i32) {
    %c0_i32 = arith.constant 0 : i32
    %c0_i32_0 = arith.constant 0 : i32
    return %arg0, %c0_i32 : i32, i32
  }
  func.func @transform_2(%arg0: i32) -> (i32, i32) {
    %c0_i32 = arith.constant 0 : i32
    %c0_i32_0 = arith.constant 0 : i32
    return %arg0, %c0_i32 : i32, i32
  }
}

</mosaic_0001>

<bundles_post_ra>
// kernel: tpu_custom_call.1
= control target key start
LH: loop header
LB: loop body
LE: loop exit
PB: predicated region body
PF: predicated region fallthrough
CT: control target
= control target key end

     0   :  { %7 = vsyncpa [#allocation3], 0  ;;  %s185_s0 = inlined_call_operand.hbm [shape: f32[8,256], index: 0, kind: input, shape index: {}]   ;;  %s186_s1 = inlined_call_operand.vmem [shape: f32[8,2], index: 1, kind: input, shape index: {}]   ;;  %s187_s2 = inlined_call_operand.hbm [shape: f32[8,256], index: 2, kind: output, shape index: {}]  }
   0x1   :  { %8 = vsyncpa [#allocation4], 0  ;;  %s14_s11 = sshll.u32 %s185_s0, 4  ;;  %s156_s12 = smov [#allocation2]   ;;  %s15_s11 = int_to_ptr.hbm [resolvable:$true] %s14_s11 }
   0x2   :  { %s16_s13 = sshll.u32 %s156_s12, 4  ;;  %s17_s13 = int_to_ptr.vmem [resolvable:$true] %s16_s13 }
   0x3   :  { %19 = dma.hbm_to_vmem [thread:$0]  %s15_s11, 256, %s17_s13, [#allocation3]  }
   0x4   :  { %152 = dma.done.wait [#allocation3], 256  }
   0x5   :  { %153 = vsyncadd [#allocation3], 4294967040  ;;  %v26_v0 = vld [vmem:[#allocation2] sm:$0xff]  ;;  %v27_v1 = vld [vmem:[#allocation2 + $0x8] sm:$0xff]  ;;  %v157_v10 = vmov 0   ;;  %s158_s15 = smov 1  }
   0x6   :  { %v28_v2 = vadd.f32 %v27_v1, %v26_v0  ;;  %99 = vset.pattern.permute.xlu1 %v157_v10  ;;  %v41_v20 = vld [vmem:[%s186_s1] sm:$0xff]  ;;  %v159_v26 = vmov 1   ;;  %s160_s16 = smov [#allocation5]   ;;  %s84_s19 = sshll.u32 %s187_s2, 4  ;;  %s85_s19 = int_to_ptr.hbm [resolvable:$true] %s84_s19 }
   0x7   :  { %100 = vset.pattern.permute.xlu2 %v159_v26  ;;  %101 = vset.pattern.permute.xlu0 %v159_v26  ;;  %s82_s1 = sshll.u32 %s160_s16, 4  ;;  %s83_s1 = int_to_ptr.vmem [resolvable:$true] %s82_s1 }
   0x8   :  { %29 = vadd.xlane.f32.xlu0 %v28_v2 }
  0x7b   :  { %v30_v3 = vpop.xlane.xlu0 %29 }
  0x7c   :  { %v31_v4 = vmul.f32 0.00390625, %v30_v3 }
  0x7e   :  { %v32_v5 = vsub.f32 %v26_v0, %v31_v4  ;;  %v33_v6 = vsub.f32 %v27_v1, %v31_v4 }
  0x80   :  { %v34_v7 = vmul.f32 %v32_v5, %v32_v5  ;;  %v35_v8 = vmul.f32 %v33_v6, %v33_v6 }
  0x82   :  { %v36_v9 = vadd.f32 %v35_v8, %v34_v7 }
  0x84   :  { %37 = vadd.xlane.f32.xlu0 %v36_v9 }
  0xf7   :  { %v38_v11 = vpop.xlane.xlu0 %37 }
  0xf8   :  { %v39_v12 = vmul.f32 0.003921569, %v38_v11 }
  0xfa   :  { %v40_v13 = vmax.f32 %v39_v12, 0.0 }
  0xfc   :  { %v42_v14 = vadd.f32 1e-05, %v40_v13 }
  0xfe   :  { %102 = vrsqrt.f32 %v42_v14  ;;  %vm49_vm1 = vweird.f32 %v42_v14 }
 0x104   :  { %v103_v15 = vpop.eup %102 }
 0x105   :  { %v44_v16 = vmul.f32 %v103_v15, %v42_v14  ;;  %vm50_vm0 = vweird.f32 %v103_v15 }
 0x106   :  { %vm51_vm2 = vmor %vm49_vm1, %vm50_vm0 }
 0x107   :  { %v45_v17 = vmul.f32 %v103_v15, %v44_v16 }
 0x109   :  { %v46_v18 = vmul.f32 0.5, %v45_v17 }
 0x10b   :  { %v47_v19 = vsub.f32 1.5, %v46_v18 }
 0x10d   :  { %v48_v21 = vmul.f32 %v103_v15, %v47_v19 }
 0x10f   :  { %v52_v22 = vsel %vm51_vm2, %v103_v15, %v48_v21 }
 0x110   :  { %v53_v23 = vmul.f32 %v52_v22, %v41_v20 }
 0x112   :  { %v55_v24 = vmul.f32 %v53_v23, %v31_v4  ;;  %v54_v25 = vadd.f32 1.0, %v53_v23 }
 0x114   :  { %57 = vrot.lane.b32.xlu1 %v55_v24, %s158_s15 }
 0x11c   :  { %63 = vperm.xlu1 %99, %v54_v25  }
 0x186   :  { %v58_v27 = vpop.permute.xlu1 %57 }
 0x187   :  { %v60_v28 = vsub.f32 %v41_v20, %v58_v27 }
 0x189   :  { %70 = vperm.xlu2 %100, %v60_v28  }
 0x18e   :  { %v64_v29 = vpop.permute.xlu1 %63 }
 0x18f   :  { %v66_v30 = vmul.f32 %v64_v29, %v26_v0  ;;  %v67_v31 = vmul.f32 %v64_v29, %v27_v1 }
 0x1e3   :  { %v71_v32 = vpop.permute.xlu2 %70 }
 0x1e4   :  { %v73_v33 = vadd.f32 %v71_v32, %v66_v30  ;;  %v74_v34 = vadd.f32 %v71_v32, %v67_v31 }
 0x1e6   :  { %75 = vst [vmem:[#allocation5] sm:$0xff] %v73_v33 }
 0x1e7   :  { %76 = vst [vmem:[#allocation5 + $0x8] sm:$0xff] %v74_v34 }
 0x1e8   :  { %87 = dma.vmem_to_hbm [thread:$0]  %s83_s1, 256, %s85_s19, [#allocation4]  }
 0x1e9   :  { %154 = dma.done.wait [#allocation4], 256  }
 0x1ea   :  { %155 = vsyncadd [#allocation4], 4294967040 }
 0x1eb   :  { %92 = vsyncpa [#allocation3], 1 }
 0x1ec   :  { %93 = vsyncpa [#allocation4], 1 }

</bundles_post_ra>
